<compile_context>
chip_gen: v6e
topology: v6e:2x2x1
jax: 0.10.0
libtpu: 0.0.40
codegen_flags: <defaults>
</compile_context>

<pallas_src>
import functools
import math

import jax
import jax.numpy as jnp
from jax.experimental import pallas as pl
from jax.experimental.pallas import tpu as pltpu


# ----------------------------------------------------------------------------
# Pallas kernel: chained complex matmul over layers for a block of filters.
# ----------------------------------------------------------------------------
def _chain_kernel(kr_ref, ki_ref, or_ref, oi_ref, *, num_layers):
    """kr_ref/ki_ref: (Fb, L, D, D) real/imag planes of per-layer Kronecker
    matrices. Writes (Fb, D, D) real/imag planes of K0 @ K1 @ ... @ K_{L-1}."""
    # Whole block is small (Fb * L * D * D * 4 bytes); load once into vregs.
    kr = kr_ref[...]
    ki = ki_ref[...]

    # Skip the identity multiply: start the accumulator at layer 0.
    ar = kr[:, 0]
    ai = ki[:, 0]

    # Static unrolled loop over the (small, compile-time) layer count.
    for layer in range(1, num_layers):
        br = kr[:, layer]
        bi = ki[:, layer]
        # (A_r + i A_i) @ (B_r + i B_i), batched over the filter axis.
        rr = jnp.einsum('bij,bjk->bik', ar, br, preferred_element_type=jnp.float32)
        ii = jnp.einsum('bij,bjk->bik', ai, bi, preferred_element_type=jnp.float32)
        ri = jnp.einsum('bij,bjk->bik', ar, bi, preferred_element_type=jnp.float32)
        ir = jnp.einsum('bij,bjk->bik', ai, br, preferred_element_type=jnp.float32)
        ar = rr - ii
        ai = ri + ir

    or_ref[...] = ar
    oi_ref[...] = ai


# ----------------------------------------------------------------------------
# Wrapper glue: per-wire 2x2 unitaries + Kronecker expansion (real arithmetic).
# ----------------------------------------------------------------------------
def _build_kron_planes(weight, phi):
    """Returns (kron_r, kron_i), each (F, L, D, D) float32."""
    F_, L, W, _ = weight.shape

    angle = weight[..., 0] * (math.pi / 2.0)        # (F, L, W)
    c = jnp.cos(angle)
    s = jnp.sin(angle)
    w1 = weight[..., 1]
    cp, sp = jnp.cos(phi), jnp.sin(phi)             # exp(i*phi)
    cw, sw = jnp.cos(w1), jnp.sin(w1)               # exp(i*w1)
    cpw, spw = jnp.cos(phi + w1), jnp.sin(phi + w1)  # exp(i*(phi+w1))
    zero = jnp.zeros_like(c)

    # U[.., 0,0]=c ; U[..,0,1]=-s*e^{i w1} ; U[..,1,0]=s*e^{i phi} ;
    # U[..,1,1]=c*e^{i(phi+w1)}   -> real/imag planes, shape (F, L, W, 2, 2).
    u_r = jnp.stack([jnp.stack([c, -s * cw], axis=-1),
                     jnp.stack([s * cp, c * cpw], axis=-1)], axis=-2)
    u_i = jnp.stack([jnp.stack([zero, -s * sw], axis=-1),
                     jnp.stack([s * sp, c * spw], axis=-1)], axis=-2)

    kr, ki = u_r[:, :, 0], u_i[:, :, 0]             # (F, L, 2, 2)
    dim = 2
    for w in range(1, W):
        br, bi = u_r[:, :, w], u_i[:, :, w]

        def kron(a, b, d=dim):
            return jnp.einsum('flij,flpq->flipjq', a, b).reshape(
                F_, L, d * 2, d * 2)

        nkr = kron(kr, br) - kron(ki, bi)
        nki = kron(kr, bi) + kron(ki, br)
        kr, ki = nkr, nki
        dim *= 2

    return kr.astype(jnp.float32), ki.astype(jnp.float32)


def unitary_forward(weight, phi, num_wires, *, apply_noise=False, noise_key=None):
    """Pallas implementation of Unitary.forward."""
    F_, L, W, _ = weight.shape
    assert W == num_wires
    D = 2 ** num_wires

    if apply_noise:
        if noise_key is None:
            noise_key = jax.random.PRNGKey(0)
        weight = weight + 0.001 * jax.random.normal(
            noise_key, weight.shape, weight.dtype)

    kron_r, kron_i = _build_kron_planes(weight, phi)

    # Filter blocking: amortize per-grid-step overhead (~0.35 us/step) and keep
    # each DMA at least a few KiB, while keeping the block small enough for
    # VMEM at large D (v7x has only 64 MiB physical VMEM).
    plane_bytes = L * D * D * 4
    fb = max(1, min(8, F_, (4 << 20) // max(plane_bytes, 1)))
    n_blocks = -(-F_ // fb)
    F_pad = n_blocks * fb
    if F_pad != F_:
        pad = ((0, F_pad - F_), (0, 0), (0, 0), (0, 0))
        kron_r = jnp.pad(kron_r, pad)
        kron_i = jnp.pad(kron_i, pad)

    kernel = functools.partial(_chain_kernel, num_layers=L)

    out_r, out_i = pl.pallas_call(
        kernel,
        out_shape=(jax.ShapeDtypeStruct((F_pad, D, D), jnp.float32),
                   jax.ShapeDtypeStruct((F_pad, D, D), jnp.float32)),
        grid_spec=pltpu.PrefetchScalarGridSpec(
            num_scalar_prefetch=0,
            grid=(n_blocks,),
            in_specs=[
                pl.BlockSpec((fb, L, D, D), lambda b: (b, 0, 0, 0)),
                pl.BlockSpec((fb, L, D, D), lambda b: (b, 0, 0, 0)),
            ],
            out_specs=[
                pl.BlockSpec((fb, D, D), lambda b: (b, 0, 0)),
                pl.BlockSpec((fb, D, D), lambda b: (b, 0, 0)),
            ],
        ),
        compiler_params=pltpu.CompilerParams(
            # Filter-block axis is independent -> parallel (uses both TCs on v7x).
            dimension_semantics=("parallel",)),
    )(kron_r, kron_i)

    # TODO(synk): for D < 128 the (.., D, D) output stores are lane-masked;
    # a block-diagonal / lane-packed output layout would make them dense, but
    # the output here is tiny so the simple layout is kept.
    return (out_r[:F_] + 1j * out_i[:F_]).astype(jnp.complex64)


# ----------------------------------------------------------------------------
# Pure-JAX reference mirroring the PyTorch module exactly (complex arithmetic).
# ----------------------------------------------------------------------------
def unitary_reference(weight, phi, num_wires):
    F_, L, W, _ = weight.shape
    D = 2 ** num_wires
    final = jnp.tile(jnp.eye(D, dtype=jnp.complex64)[None], (F_, 1, 1))
    for layer in range(L):
        cw = weight[:, layer]
        angle = cw[..., 0] * (math.pi / 2.0)
        cos_t = jnp.cos(angle).astype(jnp.complex64)
        sin_t = jnp.sin(angle).astype(jnp.complex64)
        e1 = jnp.exp(1j * phi[:, layer].astype(jnp.complex64))
        e2 = jnp.exp(1j * cw[..., 1].astype(jnp.complex64))
        U = jnp.zeros((F_, W, 2, 2), jnp.complex64)
        U = U.at[..., 0, 0].set(cos_t)
        U = U.at[..., 0, 1].set(-sin_t * e2)
        U = U.at[..., 1, 0].set(sin_t * e1)
        U = U.at[..., 1, 1].set(cos_t * e1 * e2)
        k = U[:, 0]
        for i in range(1, W):
            k = jnp.einsum('bij,bpq->bipjq', k, U[:, i]).reshape(
                F_, 2 ** (i + 1), 2 ** (i + 1))
        final = jnp.einsum('bij,bjk->bik', final, k)
    return final


if __name__ == "__main__":
    num_filters = 2
    num_layers = 3
    num_wires = 3   # -> 8x8 unitaries

    key = jax.random.PRNGKey(0)
    kw, kp = jax.random.split(key)
    weight = jax.random.normal(
        kw, (num_filters, num_layers, num_wires, 2), dtype=jnp.float32)
    phi = jax.random.normal(
        kp, (num_filters, num_layers, num_wires), dtype=jnp.float32)

    out = unitary_forward(weight, phi, num_wires)
    out = jax.block_until_ready(out)

    ref = unitary_reference(weight, phi, num_wires)
    assert out.shape == (num_filters, 2 ** num_wires, 2 ** num_wires)
    assert out.dtype == jnp.complex64
    assert jnp.allclose(out, ref, rtol=1e-4, atol=1e-5), "mismatch vs reference"

    print("KERNEL_OK")
</pallas_src>

<mosaic_0001>
module attributes {stable_mosaic.version = 11 : i64} {
  func.func @_chain_kernel(%arg0: i32, %arg1: memref<2x3x8x8xf32, #tpu.memory_space<vmem>>, %arg2: memref<2x3x8x8xf32, #tpu.memory_space<vmem>>, %arg3: memref<2x8x8xf32, #tpu.memory_space<vmem>>, %arg4: memref<2x8x8xf32, #tpu.memory_space<vmem>>) attributes {dimension_semantics = [#tpu.dimension_semantics<parallel>], iteration_bounds = array<i64: 1>, scalar_prefetch = 0 : i64, scratch_operands = 0 : i64, tpu.core_type = #tpu.core_type<tc>, window_params = [{transform_indices = @transform_0, window_bounds = array<i64: 2, 3, 8, 8>}, {transform_indices = @transform_1, window_bounds = array<i64: 2, 3, 8, 8>}, {transform_indices = @transform_2, window_bounds = array<i64: 2, 8, 8>}, {transform_indices = @transform_3, window_bounds = array<i64: 2, 8, 8>}]} {
    %c0 = arith.constant 0 : index
    %c0_0 = arith.constant 0 : index
    %c0_1 = arith.constant 0 : index
    %c0_2 = arith.constant 0 : index
    %0 = vector.load %arg1[%c0, %c0_0, %c0_1, %c0_2] : memref<2x3x8x8xf32, #tpu.memory_space<vmem>>, vector<2x3x8x8xf32>
    %c0_3 = arith.constant 0 : index
    %c0_4 = arith.constant 0 : index
    %c0_5 = arith.constant 0 : index
    %c0_6 = arith.constant 0 : index
    %1 = vector.load %arg2[%c0_3, %c0_4, %c0_5, %c0_6] : memref<2x3x8x8xf32, #tpu.memory_space<vmem>>, vector<2x3x8x8xf32>
    %2 = vector.extract_strided_slice %0 {offsets = [0, 0, 0, 0], sizes = [2, 1, 8, 8], strides = [1, 1, 1, 1]} : vector<2x3x8x8xf32> to vector<2x1x8x8xf32>
    %3 = vector.shape_cast %2 : vector<2x1x8x8xf32> to vector<2x8x8xf32>
    %4 = vector.extract_strided_slice %1 {offsets = [0, 0, 0, 0], sizes = [2, 1, 8, 8], strides = [1, 1, 1, 1]} : vector<2x3x8x8xf32> to vector<2x1x8x8xf32>
    %5 = vector.shape_cast %4 : vector<2x1x8x8xf32> to vector<2x8x8xf32>
    %6 = vector.extract_strided_slice %0 {offsets = [0, 1, 0, 0], sizes = [2, 1, 8, 8], strides = [1, 1, 1, 1]} : vector<2x3x8x8xf32> to vector<2x1x8x8xf32>
    %7 = vector.shape_cast %6 : vector<2x1x8x8xf32> to vector<2x8x8xf32>
    %8 = vector.extract_strided_slice %1 {offsets = [0, 1, 0, 0], sizes = [2, 1, 8, 8], strides = [1, 1, 1, 1]} : vector<2x3x8x8xf32> to vector<2x1x8x8xf32>
    %9 = vector.shape_cast %8 : vector<2x1x8x8xf32> to vector<2x8x8xf32>
    "tpu.trace_start"() <{level = 10 : i32, message = "bij,bjk->bik"}> : () -> ()
    %cst = arith.constant dense<0.000000e+00> : vector<2x8x8xf32>
    %10 = tpu.matmul %3, %7, %cst {dimension_numbers = #tpu.dot_dimension_numbers<[2], [1], [1], [2], [0, 0, 0, 1, 1, 2], [0], [0]>} : vector<2x8x8xf32>, vector<2x8x8xf32>, vector<2x8x8xf32> -> vector<2x8x8xf32>
    %cst_7 = arith.constant dense<0.000000e+00> : vector<2x8x8xf32>
    %11 = tpu.matmul %5, %9, %cst_7 {dimension_numbers = #tpu.dot_dimension_numbers<[2], [1], [1], [2], [0, 0, 0, 1, 1, 2], [0], [0]>} : vector<2x8x8xf32>, vector<2x8x8xf32>, vector<2x8x8xf32> -> vector<2x8x8xf32>
    %cst_8 = arith.constant dense<0.000000e+00> : vector<2x8x8xf32>
    %12 = tpu.matmul %3, %9, %cst_8 {dimension_numbers = #tpu.dot_dimension_numbers<[2], [1], [1], [2], [0, 0, 0, 1, 1, 2], [0], [0]>} : vector<2x8x8xf32>, vector<2x8x8xf32>, vector<2x8x8xf32> -> vector<2x8x8xf32>
    %cst_9 = arith.constant dense<0.000000e+00> : vector<2x8x8xf32>
    %13 = tpu.matmul %5, %7, %cst_9 {dimension_numbers = #tpu.dot_dimension_numbers<[2], [1], [1], [2], [0, 0, 0, 1, 1, 2], [0], [0]>} : vector<2x8x8xf32>, vector<2x8x8xf32>, vector<2x8x8xf32> -> vector<2x8x8xf32>
    "tpu.trace_stop"() : () -> ()
    %14 = arith.subf %10, %11 : vector<2x8x8xf32>
    %15 = arith.addf %12, %13 : vector<2x8x8xf32>
    %16 = vector.extract_strided_slice %0 {offsets = [0, 2, 0, 0], sizes = [2, 1, 8, 8], strides = [1, 1, 1, 1]} : vector<2x3x8x8xf32> to vector<2x1x8x8xf32>
    %17 = vector.shape_cast %16 : vector<2x1x8x8xf32> to vector<2x8x8xf32>
    %18 = vector.extract_strided_slice %1 {offsets = [0, 2, 0, 0], sizes = [2, 1, 8, 8], strides = [1, 1, 1, 1]} : vector<2x3x8x8xf32> to vector<2x1x8x8xf32>
    %19 = vector.shape_cast %18 : vector<2x1x8x8xf32> to vector<2x8x8xf32>
    "tpu.trace_start"() <{level = 10 : i32, message = "bij,bjk->bik"}> : () -> ()
    %cst_10 = arith.constant dense<0.000000e+00> : vector<2x8x8xf32>
    %20 = tpu.matmul %14, %17, %cst_10 {dimension_numbers = #tpu.dot_dimension_numbers<[2], [1], [1], [2], [0, 0, 0, 1, 1, 2], [0], [0]>} : vector<2x8x8xf32>, vector<2x8x8xf32>, vector<2x8x8xf32> -> vector<2x8x8xf32>
    %cst_11 = arith.constant dense<0.000000e+00> : vector<2x8x8xf32>
    %21 = tpu.matmul %15, %19, %cst_11 {dimension_numbers = #tpu.dot_dimension_numbers<[2], [1], [1], [2], [0, 0, 0, 1, 1, 2], [0], [0]>} : vector<2x8x8xf32>, vector<2x8x8xf32>, vector<2x8x8xf32> -> vector<2x8x8xf32>
    %cst_12 = arith.constant dense<0.000000e+00> : vector<2x8x8xf32>
    %22 = tpu.matmul %14, %19, %cst_12 {dimension_numbers = #tpu.dot_dimension_numbers<[2], [1], [1], [2], [0, 0, 0, 1, 1, 2], [0], [0]>} : vector<2x8x8xf32>, vector<2x8x8xf32>, vector<2x8x8xf32> -> vector<2x8x8xf32>
    %cst_13 = arith.constant dense<0.000000e+00> : vector<2x8x8xf32>
    %23 = tpu.matmul %15, %17, %cst_13 {dimension_numbers = #tpu.dot_dimension_numbers<[2], [1], [1], [2], [0, 0, 0, 1, 1, 2], [0], [0]>} : vector<2x8x8xf32>, vector<2x8x8xf32>, vector<2x8x8xf32> -> vector<2x8x8xf32>
    "tpu.trace_stop"() : () -> ()
    %24 = arith.subf %20, %21 : vector<2x8x8xf32>
    %25 = arith.addf %22, %23 : vector<2x8x8xf32>
    %c0_14 = arith.constant 0 : index
    %c0_15 = arith.constant 0 : index
    %c0_16 = arith.constant 0 : index
    %26 = vector.load %arg3[%c0_14, %c0_15, %c0_16] : memref<2x8x8xf32, #tpu.memory_space<vmem>>, vector<2x8x8xf32>
    tpu.vector_store %arg3[%c0_14, %c0_15, %c0_16], %24 {strides = array<i32>} : memref<2x8x8xf32, #tpu.memory_space<vmem>>, vector<2x8x8xf32>,
    %c0_17 = arith.constant 0 : index
    %c0_18 = arith.constant 0 : index
    %c0_19 = arith.constant 0 : index
    %27 = vector.load %arg4[%c0_17, %c0_18, %c0_19] : memref<2x8x8xf32, #tpu.memory_space<vmem>>, vector<2x8x8xf32>
    tpu.vector_store %arg4[%c0_17, %c0_18, %c0_19], %25 {strides = array<i32>} : memref<2x8x8xf32, #tpu.memory_space<vmem>>, vector<2x8x8xf32>,
    return
  }
  func.func @transform_0(%arg0: i32) -> (i32, i32, i32, i32) {
    %c0_i32 = arith.constant 0 : i32
    %c0_i32_0 = arith.constant 0 : i32
    %c0_i32_1 = arith.constant 0 : i32
    %c0_i32_2 = arith.constant 0 : i32
    return %arg0, %c0_i32, %c0_i32_0, %c0_i32_1 : i32, i32, i32, i32
  }
  func.func @transform_1(%arg0: i32) -> (i32, i32, i32, i32) {
    %c0_i32 = arith.constant 0 : i32
    %c0_i32_0 = arith.constant 0 : i32
    %c0_i32_1 = arith.constant 0 : i32
    %c0_i32_2 = arith.constant 0 : i32
    return %arg0, %c0_i32, %c0_i32_0, %c0_i32_1 : i32, i32, i32, i32
  }
  func.func @transform_2(%arg0: i32) -> (i32, i32, i32) {
    %c0_i32 = arith.constant 0 : i32
    %c0_i32_0 = arith.constant 0 : i32
    %c0_i32_1 = arith.constant 0 : i32
    return %arg0, %c0_i32, %c0_i32_0 : i32, i32, i32
  }
  func.func @transform_3(%arg0: i32) -> (i32, i32, i32) {
    %c0_i32 = arith.constant 0 : i32
    %c0_i32_0 = arith.constant 0 : i32
    %c0_i32_1 = arith.constant 0 : i32
    return %arg0, %c0_i32, %c0_i32_0 : i32, i32, i32
  }
}

</mosaic_0001>

<bundles_post_ra>
// kernel: tpu_custom_call.1
= control target key start
LH: loop header
LB: loop body
LE: loop exit
PB: predicated region body
PF: predicated region fallthrough
CT: control target
= control target key end

     0   :  { %9 = vsyncpa [#allocation3], 0  ;;  %s1586_s0 = inlined_call_operand.hbm [shape: f32[2,3,8,8], index: 0, kind: input, shape index: {}]   ;;  %s1587_s1 = inlined_call_operand.hbm [shape: f32[2,3,8,8], index: 1, kind: input, shape index: {}]   ;;  %s1588_s2 = inlined_call_operand.hbm [shape: f32[2,8,8], index: 2, kind: output, shape index: {0}]   ;;  %s1589_s3 = inlined_call_operand.hbm [shape: f32[2,8,8], index: 3, kind: output, shape index: {1}]  }
   0x1   :  { %10 = vsyncpa [#allocation6], 0 }
   0x2   :  { %11 = vsyncpa [#allocation4], 0 }
   0x3   :  { %12 = vsyncpa [#allocation9], 0  ;;  %s1466_s12 = smov [#allocation2]  }
   0x4   :  { %s18_s13 = sshll.u32 %s1466_s12, 4  ;;  %s19_s13 = int_to_ptr.vmem [resolvable:$true] %s18_s13 }
   0x5   :  { %s1386_s14 = scalar_lea.vmem %s19_s13, 768  ;;  %p1391_p1 = scmp.lt.s32.totalorder %s19_s13, %s19_s13 }
   0x6   :  { %p1387_p0 = scmp.ne.s32.totalorder %s19_s13, %s1386_s14  ;;  %p1392_p2 = scmp.lt.s32.totalorder %s1386_s14, %s1386_s14 }
   0x8   :  { %p1393_p3 = por %p1392_p2, %p1391_p1 }
   0xa   :  { %p1394_p4 = pnand %p1393_p3, %p1387_p0 }
   0xc   :  { %1397 = shalt.err (!%p1394_p4)
}
   0xd   :  { %s1467_s15 = smov 128   ;;  %s1468_s16 = smov 8  }
   0xe   :  { %24 = dma.hbm_to_vmem [thread:$0]  %s1586_s0, 768, %s19_s13, [#allocation3], %s1467_s15, %s1467_s15, %s1468_s16  }
   0xf   :  { %s1469_s19 = smov [#allocation5]  }
  0x10   :  { %s30_s20 = sshll.u32 %s1469_s19, 4  ;;  %s31_s20 = int_to_ptr.vmem [resolvable:$true] %s30_s20 }
  0x11   :  { %s1406_s21 = scalar_lea.vmem %s31_s20, 768  ;;  %p1411_p6 = scmp.lt.s32.totalorder %s31_s20, %s31_s20 }
  0x12   :  { %p1407_p5 = scmp.ne.s32.totalorder %s31_s20, %s1406_s21  ;;  %p1412_p7 = scmp.lt.s32.totalorder %s1406_s21, %s1406_s21 }
  0x14   :  { %p1413_p8 = por %p1412_p7, %p1411_p6 }
  0x16   :  { %p1414_p9 = pnand %p1413_p8, %p1407_p5 }
  0x18   :  { %1417 = shalt.err (!%p1414_p9)
}
  0x19   :  { %36 = dma.hbm_to_vmem [thread:$0]  %s1587_s1, 768, %s31_s20, [#allocation6], %s1467_s15, %s1467_s15, %s1468_s16  }
  0x1a   :  { %1458 = dma.done.wait [#allocation3], 768  }
  0x1b   :  { %1459 = vsyncadd [#allocation3], 4294966528 }
  0x1c   :  { %1460 = dma.done.wait [#allocation6], 768  }
  0x1d   :  { %1461 = vsyncadd [#allocation6], 4294966528  ;;  %v1470_v0 = vmov 0.0   ;;  %vm1471_vm0 = vmmov 0   ;;  %vm55_vm1 = vcmask 64512   ;;  %v44_v1 = vld [vmem:[#allocation2 + $0x8] sm:$0xff] }
  0x1e   :  { %1290 = vmatprep.subr.mxu0 %v1470_v0  ;;  %1295 = vmatprep.subr.mxu1 %v1470_v0  ;;  %v47_v2 = vld [vmem:[#allocation2 + $0x20] sm:$0xff]  ;;  %v46_v4 = vld [vmem:[#allocation2 + $0x18] sm:$0xff]  ;;  %v53_v6 = vld [vmem:[#allocation5 + $0x20] sm:$0xff]  ;;  %s1472_s0 = smov [#allocation7]  }
  0x1f   :  { %1292 = vmatprep.mubr.msk.f32.mxu0 %vm1471_vm0, %v1470_v0  ;;  %1297 = vmatprep.mubr.msk.f32.mxu1 %vm1471_vm0, %v1470_v0  ;;  %v43_v3 = vld [vmem:[#allocation2] sm:$0xff]  ;;  %v50_v5 = vld [vmem:[#allocation5 + $0x8] sm:$0xff]  ;;  %v49_v7 = vld [vmem:[#allocation5] sm:$0xff]  ;;  %s1213_s1 = sshll.u32 %s1472_s0, 4  ;;  %s1214_s1 = int_to_ptr.vmem [resolvable:$true] %s1213_s1 }
  0x20   :  { %1291 = vmatpush3.msra.mxu0 %v44_v1  ;;  %1296 = vmatpush3.msra.mxu1 %v47_v2  ;;  %v52_v8 = vld [vmem:[#allocation5 + $0x18] sm:$0xff]  ;;  %v45_v9 = vld [vmem:[#allocation2 + $0x10] sm:$0xff]  ;;  %v51_v19 = vld [vmem:[#allocation5 + $0x10] sm:$0xff]  ;;  %s1418_s24 = scalar_lea.vmem %s1214_s1, 256  ;;  %p1423_p11 = scmp.lt.s32.totalorder %s1214_s1, %s1214_s1 }
  0x21   :  { %1293 = vmatmul.mubr.msk.f32.vlgmr.msra.gmra.mxu0 %vm55_vm1, %v43_v3  ;;  %1298 = vmatmul.mubr.msk.f32.vlgmr.msra.gmra.mxu1 %vm55_vm1, %v46_v4  ;;  %v48_v10 = vld [vmem:[#allocation2 + $0x28] sm:$0xff]  ;;  %v54_v20 = vld [vmem:[#allocation5 + $0x28] sm:$0xff]  ;;  %p1419_p10 = scmp.ne.s32.totalorder %s1214_s1, %s1418_s24  ;;  %p1424_p12 = scmp.lt.s32.totalorder %s1418_s24, %s1418_s24 }
  0x22   :  { %1300 = vmatprep.subr.mxu0 %v1470_v0  ;;  %1305 = vmatprep.subr.mxu1 %v1470_v0 }
  0x23   :  { %1301 = vmatpush3.msra.mxu0 %v50_v5  ;;  %1306 = vmatpush3.msra.mxu1 %v53_v6  ;;  %p1425_p13 = por %p1424_p12, %p1423_p11 }
  0x24   :  { %1302 = vmatprep.mubr.msk.f32.mxu0 %vm1471_vm0, %v1470_v0  ;;  %1307 = vmatprep.mubr.msk.f32.mxu1 %vm1471_vm0, %v1470_v0 }
  0x25   :  { %1303 = vmatmul.mubr.msk.f32.vlgmr.msra.gmra.mxu0 %vm55_vm1, %v49_v7  ;;  %1308 = vmatmul.mubr.msk.f32.vlgmr.msra.gmra.mxu1 %vm55_vm1, %v52_v8  ;;  %p1426_p0 = pnand %p1425_p13, %p1419_p10 }
  0x26   :  { %1310 = vmatprep.subr.mxu0 %v1470_v0  ;;  %1315 = vmatprep.subr.mxu1 %v1470_v0 }
  0x27   :  { %1311 = vmatpush3.msra.mxu0 %v44_v1  ;;  %1316 = vmatpush3.msra.mxu1 %v47_v2 }
  0x28   :  { %1312 = vmatprep.mubr.msk.f32.mxu0 %vm1471_vm0, %v1470_v0  ;;  %1317 = vmatprep.mubr.msk.f32.mxu1 %vm1471_vm0, %v1470_v0 }
  0x29   :  { %1313 = vmatmul.mubr.msk.f32.vlgmr.msra.gmra.mxu0 %vm55_vm1, %v49_v7  ;;  %1318 = vmatmul.mubr.msk.f32.vlgmr.msra.gmra.mxu1 %vm55_vm1, %v52_v8 }
  0x2a   :  { %1320 = vmatprep.subr.mxu0 %v1470_v0  ;;  %1325 = vmatprep.subr.mxu1 %v1470_v0 }
  0x2b   :  { %1321 = vmatpush3.msra.mxu0 %v50_v5  ;;  %1326 = vmatpush3.msra.mxu1 %v53_v6 }
  0x2c   :  { %1322 = vmatprep.mubr.msk.f32.mxu0 %vm1471_vm0, %v1470_v0  ;;  %1327 = vmatprep.mubr.msk.f32.mxu1 %vm1471_vm0, %v1470_v0 }
  0x2d   :  { %1323 = vmatmul.mubr.msk.f32.vlgmr.msra.gmra.mxu0 %vm55_vm1, %v43_v3  ;;  %1328 = vmatmul.mubr.msk.f32.vlgmr.msra.gmra.mxu1 %vm55_vm1, %v46_v4 }
  0x2e   :  { %1330 = vmatprep.subr.mxu0 %v1470_v0  ;;  %1335 = vmatprep.subr.mxu1 %v1470_v0 }
  0x2f   :  { %1332 = vmatprep.mubr.msk.f32.mxu0 %vm1471_vm0, %v1470_v0  ;;  %1337 = vmatprep.mubr.msk.f32.mxu1 %vm1471_vm0, %v1470_v0 }
  0x30   :  { %1331 = vmatpush3.msra.mxu0 %v45_v9  ;;  %1336 = vmatpush3.msra.mxu1 %v48_v10 }
  0x31   :  { %1340 = vmatprep.subr.mxu0 %v1470_v0  ;;  %1345 = vmatprep.subr.mxu1 %v1470_v0 }
  0xe1   :  { %v125_v11 = vpop.f32.mrf.mxu0  ;;  %v198_v12 = vpop.f32.mrf.mxu1 }
  0xe3   :  { %v1294_v13 = vpop.f32.mrf.mxu0  ;;  %v1299_v14 = vpop.f32.mrf.mxu1 }
  0xe5   :  { %v271_v15 = vpop.f32.mrf.mxu0  ;;  %v344_v16 = vpop.f32.mrf.mxu1 }
  0xe6   :  { %v488_v17 = vsub.f32 %v125_v11, %v271_v15  ;;  %v489_v18 = vsub.f32 %v198_v12, %v344_v16 }
  0xe7   :  { %v1304_v21 = vpop.f32.mrf.mxu0  ;;  %v1309_v22 = vpop.f32.mrf.mxu1 }
  0xe8   :  { %1333 = vmatmul.mubr.msk.f32.vlgmr.msra.gmra.mxu0 %vm55_vm1, %v488_v17  ;;  %1338 = vmatmul.mubr.msk.f32.vlgmr.msra.gmra.mxu1 %vm55_vm1, %v489_v18 }
  0xe9   :  { %v414_v23 = vpop.f32.mrf.mxu0  ;;  %v484_v24 = vpop.f32.mrf.mxu1  ;;  %1341 = vmatpush3.msra.mxu0 %v51_v19  ;;  %1346 = vmatpush3.msra.mxu1 %v54_v20 }
  0xea   :  { %1342 = vmatprep.mubr.msk.f32.mxu0 %vm1471_vm0, %v1470_v0  ;;  %1347 = vmatprep.mubr.msk.f32.mxu1 %vm1471_vm0, %v1470_v0 }
  0xeb   :  { %v1314_v25 = vpop.f32.mrf.mxu0  ;;  %v1319_v26 = vpop.f32.mrf.mxu1  ;;  %1350 = vmatprep.subr.mxu0 %v1470_v0  ;;  %1355 = vmatprep.subr.mxu1 %v1470_v0 }
  0xed   :  { %v556_v27 = vpop.f32.mrf.mxu0  ;;  %v626_v28 = vpop.f32.mrf.mxu1 }
  0xee   :  { %v557_v29 = vadd.f32 %v556_v27, %v414_v23  ;;  %v627_v30 = vadd.f32 %v626_v28, %v484_v24 }
  0xef   :  { %v1324_v31 = vpop.f32.mrf.mxu0  ;;  %v1329_v32 = vpop.f32.mrf.mxu1 }
  0xf0   :  { %1343 = vmatmul.mubr.msk.f32.vlgmr.msra.gmra.mxu0 %vm55_vm1, %v557_v29  ;;  %1348 = vmatmul.mubr.msk.f32.vlgmr.msra.gmra.mxu1 %vm55_vm1, %v627_v30 }
  0xf1   :  { %1351 = vmatpush3.msra.mxu0 %v45_v9  ;;  %1356 = vmatpush3.msra.mxu1 %v48_v10 }
  0xf2   :  { %1352 = vmatprep.mubr.msk.f32.mxu0 %vm1471_vm0, %v1470_v0  ;;  %1357 = vmatprep.mubr.msk.f32.mxu1 %vm1471_vm0, %v1470_v0 }
  0xf3   :  { %1360 = vmatprep.subr.mxu0 %v1470_v0  ;;  %1365 = vmatprep.subr.mxu1 %v1470_v0 }
  0xf4   :  { %1353 = vmatmul.mubr.msk.f32.vlgmr.msra.gmra.mxu0 %vm55_vm1, %v557_v29  ;;  %1358 = vmatmul.mubr.msk.f32.vlgmr.msra.gmra.mxu1 %vm55_vm1, %v627_v30 }
  0xf5   :  { %1361 = vmatpush3.msra.mxu0 %v51_v19  ;;  %1366 = vmatpush3.msra.mxu1 %v54_v20 }
  0xf6   :  { %1362 = vmatprep.mubr.msk.f32.mxu0 %vm1471_vm0, %v1470_v0  ;;  %1367 = vmatprep.mubr.msk.f32.mxu1 %vm1471_vm0, %v1470_v0 }
  0xf8   :  { %1363 = vmatmul.mubr.msk.f32.vlgmr.msra.gmra.mxu0 %vm55_vm1, %v488_v17  ;;  %1368 = vmatmul.mubr.msk.f32.vlgmr.msra.gmra.mxu1 %vm55_vm1, %v489_v18 }
 0x1a8   :  { %v699_v33 = vpop.f32.mrf.mxu0  ;;  %v772_v34 = vpop.f32.mrf.mxu1 }
 0x1aa   :  { %v1334_v35 = vpop.f32.mrf.mxu0  ;;  %v1339_v36 = vpop.f32.mrf.mxu1 }
 0x1b0   :  { %v845_v37 = vpop.f32.mrf.mxu0  ;;  %v918_v38 = vpop.f32.mrf.mxu1 }
 0x1b1   :  { %v1062_v39 = vsub.f32 %v699_v33, %v845_v37  ;;  %v1063_v40 = vsub.f32 %v772_v34, %v918_v38 }
 0x1b2   :  { %v1344_v41 = vpop.f32.mrf.mxu0  ;;  %v1349_v42 = vpop.f32.mrf.mxu1 }
 0x1b3   :  { %1204 = vst.msk [vmem:[#allocation7] sm:$0xff] %vm55_vm1, %v1062_v39  ;;  %1205 = vst.msk [vmem:[#allocation7 + $0x8] sm:$0xff] %vm55_vm1, %v1063_v40 }
 0x1b4   :  { %v988_v43 = vpop.f32.mrf.mxu0  ;;  %v1058_v44 = vpop.f32.mrf.mxu1 }
 0x1b5   :  { %1429 = shalt.err (!%p1426_p0)
}
 0x1b6   :  { %1219 = dma.vmem_to_hbm [thread:$0]  %s1214_s1, 256, %s1588_s2, [#allocation4], %s1467_s15, %s1467_s15, %s1468_s16   ;;  %v1354_v45 = vpop.f32.mrf.mxu0  ;;  %v1359_v46 = vpop.f32.mrf.mxu1 }
 0x1b7   :  { %s1473_s27 = smov [#allocation8]  }
 0x1b8   :  { %s1225_s28 = sshll.u32 %s1473_s27, 4  ;;  %v1130_v47 = vpop.f32.mrf.mxu0  ;;  %v1200_v48 = vpop.f32.mrf.mxu1  ;;  %s1226_s28 = int_to_ptr.vmem [resolvable:$true] %s1225_s28 }
 0x1b9   :  { %v1131_v49 = vadd.f32 %v1130_v47, %v988_v43  ;;  %v1201_v50 = vadd.f32 %v1200_v48, %v1058_v44  ;;  %s1438_s29 = scalar_lea.vmem %s1226_s28, 256  ;;  %p1443_p2 = scmp.lt.s32.totalorder %s1226_s28, %s1226_s28 }
 0x1ba   :  { %v1364_v51 = vpop.f32.mrf.mxu0  ;;  %v1369_v52 = vpop.f32.mrf.mxu1  ;;  %p1439_p1 = scmp.ne.s32.totalorder %s1226_s28, %s1438_s29  ;;  %p1444_p3 = scmp.lt.s32.totalorder %s1438_s29, %s1438_s29 }
 0x1bb   :  { %1206 = vst.msk [vmem:[#allocation8] sm:$0xff] %vm55_vm1, %v1131_v49  ;;  %1207 = vst.msk [vmem:[#allocation8 + $0x8] sm:$0xff] %vm55_vm1, %v1201_v50 }
 0x1bc   :  { %p1445_p4 = por %p1444_p3, %p1443_p2 }
 0x1be   :  { %p1446_p5 = pnand %p1445_p4, %p1439_p1 }
 0x1c0   :  { %1449 = shalt.err (!%p1446_p5)
}
 0x1c1   :  { %1231 = dma.vmem_to_hbm [thread:$0]  %s1226_s28, 256, %s1589_s3, [#allocation9], %s1467_s15, %s1467_s15, %s1468_s16  }
 0x1c2   :  { %1462 = dma.done.wait [#allocation4], 256  }
 0x1c3   :  { %1463 = vsyncadd [#allocation4], 4294967040 }
 0x1c4   :  { %1464 = dma.done.wait [#allocation9], 256  }
 0x1c5   :  { %1465 = vsyncadd [#allocation9], 4294967040 }
 0x1c6   :  { %1238 = vsyncpa [#allocation3], 1 }
 0x1c7   :  { %1239 = vsyncpa [#allocation6], 1 }
 0x1c8   :  { %1240 = vsyncpa [#allocation4], 1 }
 0x1c9   :  { %1241 = vsyncpa [#allocation9], 1 }

</bundles_post_ra>
